<compile_context>
chip_gen: v7x
topology: tpu7x:2x2x1
jax: 0.10.0
libtpu: 0.0.40
codegen_flags: <defaults>
</compile_context>

<pallas_src>
import functools
import numpy as np
import jax
import jax.numpy as jnp
from jax.experimental import pallas as pl
from jax.experimental.pallas import tpu as pltpu


def _round_up(v, m):
    return ((v + m - 1) // m) * m


def _derive_vmem_limit(fraction=0.75):
    # Per-generation VMEM budget instead of a hard-coded 64 MiB (v7x has only
    # 64 MiB/TC; leave headroom for double-buffered blocks & compiler scratch).
    try:
        info = pltpu.get_tpu_info()
        cap = getattr(info, "vmem_capacity_bytes", None)
        if cap:
            return int(cap * fraction)
    except Exception:
        pass
    return None


# ---------------------------------------------------------------------------
# In-kernel helper: 3x3 SAME conv (+ folded-BN bias + ReLU) as 3 accumulated
# row matmuls (dy = 0..2, K = 3*C each).  Operands bf16, accumulation f32.
# ---------------------------------------------------------------------------
def _conv3x3_bn_relu(x, w_ref, b_ref):
    # x     : (Ho, Wo, C)      bf16 activation (unpadded).
    # w_ref : (3, 3*C, Cout_p) bf16 weights, BN scale folded, K order = (dx, c).
    # b_ref : (1, Cout_p)      f32 folded BN bias.
    # returns (Ho*Wo, Cout_p)  f32, post-ReLU.
    Ho, Wo, C = x.shape
    cout_p = w_ref.shape[-1]

    # Halo as values -> no scratch to re-zero, no misaligned interior stores.
    zcol = jnp.zeros((Ho, 1, C), x.dtype)
    xw = jnp.concatenate([zcol, x, zcol], axis=1)                # (Ho, Wo+2, C)
    # Pack the three dx taps on the lane axis: K = 3*C per dy matmul.
    rowk = jnp.concatenate(
        [xw[:, 0:Wo, :], xw[:, 1:Wo + 1, :], xw[:, 2:Wo + 2, :]],
        axis=-1)                                                 # (Ho, Wo, 3C)
    zrow = jnp.zeros((1, Wo, 3 * C), x.dtype)
    rows = jnp.concatenate([zrow, rowk, zrow], axis=0)           # (Ho+2, Wo, 3C)

    acc = jnp.zeros((Ho * Wo, cout_p), jnp.float32)
    for dy in range(3):                                          # 3 row matmuls
        lhs = rows[dy:dy + Ho].reshape(Ho * Wo, 3 * C)
        acc = acc + jnp.dot(lhs, w_ref[dy],
                            preferred_element_type=jnp.float32)
    return jnp.maximum(acc + b_ref[...], 0.0)


# ---------------------------------------------------------------------------
# Fused kernel: MaxPool2d(2) -> [Conv3x3 + foldedBN + ReLU] x 2
# ---------------------------------------------------------------------------
def _down_fused_kernel(x_ref, w1_ref, b1_ref, w2_ref, b2_ref, o_ref):
    # x_ref : (Ho, 2, Wo, 2*Cin) one batch element (H split, W pair on lanes).
    # o_ref : (Ho*Wo, Cout_p)    f32, lane-dense (Cout_p multiple of 128).
    Ho, _, Wo, c2 = x_ref.shape
    cin = c2 // 2
    cmid_p = w1_ref.shape[-1]

    # MaxPool2d(2): H-pair max (leading-dim slabs), W-pair max (lane halves).
    hm = jnp.maximum(x_ref[:, 0, :, :], x_ref[:, 1, :, :])       # (Ho, Wo, 2Cin)
    pooled = jnp.maximum(hm[..., :cin], hm[..., cin:])           # (Ho, Wo, Cin)
    pooled = pooled.astype(jnp.bfloat16)

    y1 = _conv3x3_bn_relu(pooled, w1_ref, b1_ref)                # (Ho*Wo, Cmid_p)
    y1 = y1.reshape(Ho, Wo, cmid_p).astype(jnp.bfloat16)

    y2 = _conv3x3_bn_relu(y1, w2_ref, b2_ref)                    # (Ho*Wo, Cout_p)
    o_ref[...] = y2.astype(o_ref.dtype)


def down_forward(x_nchw, params, *, out_channels):
    N, Cin, H, W = x_nchw.shape
    Ho, Wo = H // 2, W // 2
    cmid_p = params["w1"].shape[-1]
    cout_p = params["w2"].shape[-1]

    # PyTorch-compat shim: NCHW -> NHWC.  (A caller already holding NHWC
    # should feed the packed layout below directly and skip this relayout.)
    x = jnp.transpose(x_nchw, (0, 2, 3, 1))
    # Free reshape: split H into (Ho, 2), fold the W pooling pair onto lanes.
    xr = x.reshape(N, Ho, 2, Wo, 2 * Cin)

    cp_kwargs = dict(dimension_semantics=("parallel",))
    vmem_limit = _derive_vmem_limit()
    if vmem_limit is not None:
        cp_kwargs["vmem_limit_bytes"] = vmem_limit

    out_flat = pl.pallas_call(
        _down_fused_kernel,
        out_shape=jax.ShapeDtypeStruct((N, Ho * Wo, cout_p), jnp.float32),
        grid=(N,),
        in_specs=[
            pl.BlockSpec((None, Ho, 2, Wo, 2 * Cin),
                         lambda n: (n, 0, 0, 0, 0)),
            pl.BlockSpec((3, 3 * Cin, cmid_p), lambda n: (0, 0, 0)),
            pl.BlockSpec((1, cmid_p), lambda n: (0, 0)),
            pl.BlockSpec((3, 3 * cmid_p, cout_p), lambda n: (0, 0, 0)),
            pl.BlockSpec((1, cout_p), lambda n: (0, 0)),
        ],
        out_specs=pl.BlockSpec((None, Ho * Wo, cout_p), lambda n: (n, 0, 0)),
        compiler_params=pltpu.CompilerParams(**cp_kwargs),
    )(xr, params["w1"], params["b1"], params["w2"], params["b2"])

    out = out_flat.reshape(N, Ho, Wo, cout_p)[..., :out_channels]
    return jnp.transpose(out, (0, 3, 1, 2))                      # NHWC -> NCHW


# ---------------------------------------------------------------------------
# Params: synthetic conv weights, eval-mode BN (PyTorch defaults) folded into
# the weights, mid/out channels zero-padded to multiples of 128 (lane-dense /
# MXU-friendly; padded channels stay exactly 0 through conv+bias+ReLU), and
# pre-reshaped to the per-dy (3, 3*C, Cout_p) im2col layout in bf16.
# ---------------------------------------------------------------------------
def init_down_params(key, in_channels, out_channels, mid_channels=None):
    if mid_channels is None:
        mid_channels = out_channels                 # DoubleConv default
    mid_p = max(128, _round_up(mid_channels, 128))
    out_p = max(128, _round_up(out_channels, 128))

    k1, k2 = jax.random.split(key)
    w1 = jax.random.normal(k1, (3, 3, in_channels, mid_channels),
                           jnp.float32) * 0.1
    w2 = jax.random.normal(k2, (3, 3, mid_channels, out_channels),
                           jnp.float32) * 0.1

    eps = 1e-5

    def bn_fold(c):
        gamma = jnp.ones((c,), jnp.float32)
        beta = jnp.zeros((c,), jnp.float32)
        mean = jnp.zeros((c,), jnp.float32)
        var = jnp.ones((c,), jnp.float32)
        scale = gamma / jnp.sqrt(var + eps)
        bias = beta - mean * scale
        return scale, bias

    s1, b1 = bn_fold(mid_channels)
    s2, b2 = bn_fold(out_channels)

    w1 = w1 * s1.reshape(1, 1, 1, mid_channels)
    w2 = w2 * s2.reshape(1, 1, 1, out_channels)

    w1p = jnp.zeros((3, 3, in_channels, mid_p), jnp.float32
                    ).at[..., :mid_channels].set(w1)
    w2p = jnp.zeros((3, 3, mid_p, out_p), jnp.float32
                    ).at[:, :, :mid_channels, :out_channels].set(w2)
    b1p = jnp.zeros((mid_p,), jnp.float32).at[:mid_channels].set(b1)
    b2p = jnp.zeros((out_p,), jnp.float32).at[:out_channels].set(b2)

    # Row order: dy, then (dx, cin) flattened into K — matches the kernel's
    # lane-concat [left, center, right] operand construction.
    w1f = w1p.reshape(3, 3 * in_channels, mid_p).astype(jnp.bfloat16)
    w2f = w2p.reshape(3, 3 * mid_p, out_p).astype(jnp.bfloat16)

    return dict(w1=w1f, b1=b1p.reshape(1, mid_p),
                w2=w2f, b2=b2p.reshape(1, out_p))


# ---------------------------------------------------------------------------
# Pure-JAX reference (same math: bf16 conv operands, f32 accumulation)
# ---------------------------------------------------------------------------
def down_reference(x_nchw, params, *, out_channels):
    x = jnp.transpose(x_nchw, (0, 2, 3, 1))
    x = jax.lax.reduce_window(x, -jnp.inf, jax.lax.max,
                              (1, 2, 2, 1), (1, 2, 2, 1), "VALID")

    def conv_bn_relu(x, w_flat, b):
        cin = w_flat.shape[1] // 3
        cout = w_flat.shape[-1]
        w = w_flat.reshape(3, 3, cin, cout)         # HWIO, bf16, BN-folded
        y = jax.lax.conv_general_dilated(
            x.astype(jnp.bfloat16), w, (1, 1), "SAME",
            dimension_numbers=("NHWC", "HWIO", "NHWC"),
            preferred_element_type=jnp.float32)
        return jnp.maximum(y + b.reshape(1, 1, 1, cout), 0.0)

    x = conv_bn_relu(x, params["w1"], params["b1"])
    x = conv_bn_relu(x, params["w2"], params["b2"])
    x = x[..., :out_channels]
    return jnp.transpose(x, (0, 3, 1, 2))


if __name__ == "__main__":
    key = jax.random.PRNGKey(0)
    kx, kp = jax.random.split(key)

    N, Cin, H, W = 2, 4, 16, 16
    Cout = 8
    x = jax.random.normal(kx, (N, Cin, H, W), jnp.float32)
    params = init_down_params(kp, Cin, Cout)

    fwd = jax.jit(functools.partial(down_forward, out_channels=Cout))
    out = jax.block_until_ready(fwd(x, params))
    assert out.shape == (N, Cout, H // 2, W // 2), out.shape

    ref = jax.block_until_ready(down_reference(x, params, out_channels=Cout))
    # Both paths use identical bf16 operands; only f32 accumulation order (and
    # rare bf16 rounding of the intermediate activation) differs.
    np.testing.assert_allclose(np.asarray(out), np.asarray(ref),
                               rtol=1e-2, atol=1e-2)

    print("KERNEL_OK")
</pallas_src>

<mosaic_0001>
module attributes {stable_mosaic.version = 11 : i64} {
  func.func @_down_fused_kernel(%arg0: i32, %arg1: memref<1x8x2x8x8xf32, #tpu.memory_space<vmem>>, %arg2: memref<3x12x128xbf16, #tpu.memory_space<vmem>>, %arg3: memref<1x128xf32, #tpu.memory_space<vmem>>, %arg4: memref<3x384x128xbf16, #tpu.memory_space<vmem>>, %arg5: memref<1x128xf32, #tpu.memory_space<vmem>>, %arg6: memref<1x64x128xf32, #tpu.memory_space<vmem>>) attributes {dimension_semantics = [#tpu.dimension_semantics<parallel>], iteration_bounds = array<i64: 2>, scalar_prefetch = 0 : i64, scratch_operands = 0 : i64, tpu.core_type = #tpu.core_type<tc>, window_params = [{transform_indices = @transform_0, window_bounds = array<i64: 1, 8, 2, 8, 8>}, {pipeline_mode = #tpu.pipeline_mode<synchronous>, transform_indices = @transform_1, window_bounds = array<i64: 3, 12, 128>}, {pipeline_mode = #tpu.pipeline_mode<synchronous>, transform_indices = @transform_2, window_bounds = array<i64: 1, 128>}, {pipeline_mode = #tpu.pipeline_mode<synchronous>, transform_indices = @transform_3, window_bounds = array<i64: 3, 384, 128>}, {pipeline_mode = #tpu.pipeline_mode<synchronous>, transform_indices = @transform_4, window_bounds = array<i64: 1, 128>}, {transform_indices = @transform_5, window_bounds = array<i64: 1, 64, 128>}]} {
    %c0 = arith.constant 0 : index
    %c0_0 = arith.constant 0 : index
    %c0_1 = arith.constant 0 : index
    %c0_2 = arith.constant 0 : index
    %c0_3 = arith.constant 0 : index
    %0 = vector.load %arg1[%c0, %c0_0, %c0_1, %c0_2, %c0_3] : memref<1x8x2x8x8xf32, #tpu.memory_space<vmem>>, vector<1x8x1x8x8xf32>
    %1 = vector.shape_cast %0 : vector<1x8x1x8x8xf32> to vector<8x8x8xf32>
    %c0_4 = arith.constant 0 : index
    %c0_5 = arith.constant 0 : index
    %c1 = arith.constant 1 : index
    %c0_6 = arith.constant 0 : index
    %c0_7 = arith.constant 0 : index
    %2 = vector.load %arg1[%c0_4, %c0_5, %c1, %c0_6, %c0_7] : memref<1x8x2x8x8xf32, #tpu.memory_space<vmem>>, vector<1x8x1x8x8xf32>
    %3 = vector.shape_cast %2 : vector<1x8x1x8x8xf32> to vector<8x8x8xf32>
    %4 = arith.maximumf %1, %3 : vector<8x8x8xf32>
    %5 = vector.extract_strided_slice %4 {offsets = [0, 0, 0], sizes = [8, 8, 4], strides = [1, 1, 1]} : vector<8x8x8xf32> to vector<8x8x4xf32>
    %6 = vector.extract_strided_slice %4 {offsets = [0, 0, 4], sizes = [8, 8, 4], strides = [1, 1, 1]} : vector<8x8x8xf32> to vector<8x8x4xf32>
    %7 = arith.maximumf %5, %6 : vector<8x8x4xf32>
    %8 = arith.truncf %7 : vector<8x8x4xf32> to vector<8x8x4xbf16>
    %cst = arith.constant 0.000000e+00 : bf16
    %9 = vector.broadcast %cst : bf16 to vector<8x1x4xbf16>
    %10 = tpu.concatenate %9, %8, %9 in 1 : vector<8x1x4xbf16>, vector<8x8x4xbf16>, vector<8x1x4xbf16> -> vector<8x10x4xbf16>
    %11 = vector.extract_strided_slice %10 {offsets = [0, 0, 0], sizes = [8, 8, 4], strides = [1, 1, 1]} : vector<8x10x4xbf16> to vector<8x8x4xbf16>
    %12 = vector.extract_strided_slice %10 {offsets = [0, 1, 0], sizes = [8, 8, 4], strides = [1, 1, 1]} : vector<8x10x4xbf16> to vector<8x8x4xbf16>
    %13 = vector.extract_strided_slice %10 {offsets = [0, 2, 0], sizes = [8, 8, 4], strides = [1, 1, 1]} : vector<8x10x4xbf16> to vector<8x8x4xbf16>
    %14 = tpu.concatenate %11, %12, %13 in 2 : vector<8x8x4xbf16>, vector<8x8x4xbf16>, vector<8x8x4xbf16> -> vector<8x8x12xbf16>
    %cst_8 = arith.constant 0.000000e+00 : bf16
    %15 = vector.broadcast %cst_8 : bf16 to vector<1x8x12xbf16>
    %16 = tpu.concatenate %15, %14, %15 in 0 : vector<1x8x12xbf16>, vector<8x8x12xbf16>, vector<1x8x12xbf16> -> vector<10x8x12xbf16>
    %cst_9 = arith.constant 0.000000e+00 : f32
    %17 = vector.broadcast %cst_9 : f32 to vector<64x128xf32>
    %18 = vector.extract_strided_slice %16 {offsets = [0, 0, 0], sizes = [8, 8, 12], strides = [1, 1, 1]} : vector<10x8x12xbf16> to vector<8x8x12xbf16>
    %19 = vector.shape_cast %18 : vector<8x8x12xbf16> to vector<64x12xbf16>
    %c0_10 = arith.constant 0 : index
    %c0_11 = arith.constant 0 : index
    %c0_12 = arith.constant 0 : index
    %20 = vector.load %arg2[%c0_10, %c0_11, %c0_12] : memref<3x12x128xbf16, #tpu.memory_space<vmem>>, vector<1x12x128xbf16>
    %21 = vector.shape_cast %20 : vector<1x12x128xbf16> to vector<12x128xbf16>
    %cst_13 = arith.constant dense<0.000000e+00> : vector<64x128xf32>
    %22 = tpu.matmul %19, %21, %cst_13 {dimension_numbers = #tpu.dot_dimension_numbers<[1], [0], [0], [1], [0, 0, 1, 1], [], []>} : vector<64x12xbf16>, vector<12x128xbf16>, vector<64x128xf32> -> vector<64x128xf32>
    %23 = arith.addf %17, %22 : vector<64x128xf32>
    %24 = vector.extract_strided_slice %16 {offsets = [1, 0, 0], sizes = [8, 8, 12], strides = [1, 1, 1]} : vector<10x8x12xbf16> to vector<8x8x12xbf16>
    %25 = vector.shape_cast %24 : vector<8x8x12xbf16> to vector<64x12xbf16>
    %c1_14 = arith.constant 1 : index
    %c0_15 = arith.constant 0 : index
    %c0_16 = arith.constant 0 : index
    %26 = vector.load %arg2[%c1_14, %c0_15, %c0_16] : memref<3x12x128xbf16, #tpu.memory_space<vmem>>, vector<1x12x128xbf16>
    %27 = vector.shape_cast %26 : vector<1x12x128xbf16> to vector<12x128xbf16>
    %cst_17 = arith.constant dense<0.000000e+00> : vector<64x128xf32>
    %28 = tpu.matmul %25, %27, %cst_17 {dimension_numbers = #tpu.dot_dimension_numbers<[1], [0], [0], [1], [0, 0, 1, 1], [], []>} : vector<64x12xbf16>, vector<12x128xbf16>, vector<64x128xf32> -> vector<64x128xf32>
    %29 = arith.addf %23, %28 : vector<64x128xf32>
    %30 = vector.extract_strided_slice %16 {offsets = [2, 0, 0], sizes = [8, 8, 12], strides = [1, 1, 1]} : vector<10x8x12xbf16> to vector<8x8x12xbf16>
    %31 = vector.shape_cast %30 : vector<8x8x12xbf16> to vector<64x12xbf16>
    %c2 = arith.constant 2 : index
    %c0_18 = arith.constant 0 : index
    %c0_19 = arith.constant 0 : index
    %32 = vector.load %arg2[%c2, %c0_18, %c0_19] : memref<3x12x128xbf16, #tpu.memory_space<vmem>>, vector<1x12x128xbf16>
    %33 = vector.shape_cast %32 : vector<1x12x128xbf16> to vector<12x128xbf16>
    %cst_20 = arith.constant dense<0.000000e+00> : vector<64x128xf32>
    %34 = tpu.matmul %31, %33, %cst_20 {dimension_numbers = #tpu.dot_dimension_numbers<[1], [0], [0], [1], [0, 0, 1, 1], [], []>} : vector<64x12xbf16>, vector<12x128xbf16>, vector<64x128xf32> -> vector<64x128xf32>
    %35 = arith.addf %29, %34 : vector<64x128xf32>
    %c0_21 = arith.constant 0 : index
    %c0_22 = arith.constant 0 : index
    %36 = vector.load %arg3[%c0_21, %c0_22] : memref<1x128xf32, #tpu.memory_space<vmem>>, vector<1x128xf32>
    %37 = vector.broadcast %36 : vector<1x128xf32> to vector<64x128xf32>
    %38 = arith.addf %35, %37 : vector<64x128xf32>
    %cst_23 = arith.constant 0.000000e+00 : f32
    %39 = vector.broadcast %cst_23 : f32 to vector<64x128xf32>
    %40 = arith.maximumf %38, %39 : vector<64x128xf32>
    %41 = vector.shape_cast %40 : vector<64x128xf32> to vector<8x8x128xf32>
    %42 = arith.truncf %41 : vector<8x8x128xf32> to vector<8x8x128xbf16>
    %cst_24 = arith.constant 0.000000e+00 : bf16
    %43 = vector.broadcast %cst_24 : bf16 to vector<8x1x128xbf16>
    %44 = tpu.concatenate %43, %42, %43 in 1 : vector<8x1x128xbf16>, vector<8x8x128xbf16>, vector<8x1x128xbf16> -> vector<8x10x128xbf16>
    %45 = vector.extract_strided_slice %44 {offsets = [0, 0, 0], sizes = [8, 8, 128], strides = [1, 1, 1]} : vector<8x10x128xbf16> to vector<8x8x128xbf16>
    %46 = vector.extract_strided_slice %44 {offsets = [0, 1, 0], sizes = [8, 8, 128], strides = [1, 1, 1]} : vector<8x10x128xbf16> to vector<8x8x128xbf16>
    %47 = vector.extract_strided_slice %44 {offsets = [0, 2, 0], sizes = [8, 8, 128], strides = [1, 1, 1]} : vector<8x10x128xbf16> to vector<8x8x128xbf16>
    %48 = tpu.concatenate %45, %46, %47 in 2 : vector<8x8x128xbf16>, vector<8x8x128xbf16>, vector<8x8x128xbf16> -> vector<8x8x384xbf16>
    %cst_25 = arith.constant 0.000000e+00 : bf16
    %49 = vector.broadcast %cst_25 : bf16 to vector<1x8x384xbf16>
    %50 = tpu.concatenate %49, %48, %49 in 0 : vector<1x8x384xbf16>, vector<8x8x384xbf16>, vector<1x8x384xbf16> -> vector<10x8x384xbf16>
    %cst_26 = arith.constant 0.000000e+00 : f32
    %51 = vector.broadcast %cst_26 : f32 to vector<64x128xf32>
    %52 = vector.extract_strided_slice %50 {offsets = [0, 0, 0], sizes = [8, 8, 384], strides = [1, 1, 1]} : vector<10x8x384xbf16> to vector<8x8x384xbf16>
    %53 = vector.shape_cast %52 : vector<8x8x384xbf16> to vector<64x384xbf16>
    %c0_27 = arith.constant 0 : index
    %c0_28 = arith.constant 0 : index
    %c0_29 = arith.constant 0 : index
    %54 = vector.load %arg4[%c0_27, %c0_28, %c0_29] : memref<3x384x128xbf16, #tpu.memory_space<vmem>>, vector<1x384x128xbf16>
    %55 = vector.shape_cast %54 : vector<1x384x128xbf16> to vector<384x128xbf16>
    %cst_30 = arith.constant dense<0.000000e+00> : vector<64x128xf32>
    %56 = tpu.matmul %53, %55, %cst_30 {dimension_numbers = #tpu.dot_dimension_numbers<[1], [0], [0], [1], [0, 0, 1, 1], [], []>} : vector<64x384xbf16>, vector<384x128xbf16>, vector<64x128xf32> -> vector<64x128xf32>
    %57 = arith.addf %51, %56 : vector<64x128xf32>
    %58 = vector.extract_strided_slice %50 {offsets = [1, 0, 0], sizes = [8, 8, 384], strides = [1, 1, 1]} : vector<10x8x384xbf16> to vector<8x8x384xbf16>
    %59 = vector.shape_cast %58 : vector<8x8x384xbf16> to vector<64x384xbf16>
    %c1_31 = arith.constant 1 : index
    %c0_32 = arith.constant 0 : index
    %c0_33 = arith.constant 0 : index
    %60 = vector.load %arg4[%c1_31, %c0_32, %c0_33] : memref<3x384x128xbf16, #tpu.memory_space<vmem>>, vector<1x384x128xbf16>
    %61 = vector.shape_cast %60 : vector<1x384x128xbf16> to vector<384x128xbf16>
    %cst_34 = arith.constant dense<0.000000e+00> : vector<64x128xf32>
    %62 = tpu.matmul %59, %61, %cst_34 {dimension_numbers = #tpu.dot_dimension_numbers<[1], [0], [0], [1], [0, 0, 1, 1], [], []>} : vector<64x384xbf16>, vector<384x128xbf16>, vector<64x128xf32> -> vector<64x128xf32>
    %63 = arith.addf %57, %62 : vector<64x128xf32>
    %64 = vector.extract_strided_slice %50 {offsets = [2, 0, 0], sizes = [8, 8, 384], strides = [1, 1, 1]} : vector<10x8x384xbf16> to vector<8x8x384xbf16>
    %65 = vector.shape_cast %64 : vector<8x8x384xbf16> to vector<64x384xbf16>
    %c2_35 = arith.constant 2 : index
    %c0_36 = arith.constant 0 : index
    %c0_37 = arith.constant 0 : index
    %66 = vector.load %arg4[%c2_35, %c0_36, %c0_37] : memref<3x384x128xbf16, #tpu.memory_space<vmem>>, vector<1x384x128xbf16>
    %67 = vector.shape_cast %66 : vector<1x384x128xbf16> to vector<384x128xbf16>
    %cst_38 = arith.constant dense<0.000000e+00> : vector<64x128xf32>
    %68 = tpu.matmul %65, %67, %cst_38 {dimension_numbers = #tpu.dot_dimension_numbers<[1], [0], [0], [1], [0, 0, 1, 1], [], []>} : vector<64x384xbf16>, vector<384x128xbf16>, vector<64x128xf32> -> vector<64x128xf32>
    %69 = arith.addf %63, %68 : vector<64x128xf32>
    %c0_39 = arith.constant 0 : index
    %c0_40 = arith.constant 0 : index
    %70 = vector.load %arg5[%c0_39, %c0_40] : memref<1x128xf32, #tpu.memory_space<vmem>>, vector<1x128xf32>
    %71 = vector.broadcast %70 : vector<1x128xf32> to vector<64x128xf32>
    %72 = arith.addf %69, %71 : vector<64x128xf32>
    %cst_41 = arith.constant 0.000000e+00 : f32
    %73 = vector.broadcast %cst_41 : f32 to vector<64x128xf32>
    %74 = arith.maximumf %72, %73 : vector<64x128xf32>
    %c0_42 = arith.constant 0 : index
    %c0_43 = arith.constant 0 : index
    %c0_44 = arith.constant 0 : index
    %75 = vector.load %arg6[%c0_42, %c0_43, %c0_44] : memref<1x64x128xf32, #tpu.memory_space<vmem>>, vector<1x64x128xf32>
    %76 = vector.shape_cast %75 : vector<1x64x128xf32> to vector<64x128xf32>
    %77 = vector.shape_cast %74 : vector<64x128xf32> to vector<1x64x128xf32>
    tpu.vector_store %arg6[%c0_42, %c0_43, %c0_44], %77 {strides = array<i32>} : memref<1x64x128xf32, #tpu.memory_space<vmem>>, vector<1x64x128xf32>,
    return
  }
  func.func @transform_0(%arg0: i32) -> (i32, i32, i32, i32, i32) {
    %c0_i32 = arith.constant 0 : i32
    %c0_i32_0 = arith.constant 0 : i32
    %c0_i32_1 = arith.constant 0 : i32
    %c0_i32_2 = arith.constant 0 : i32
    %c0_i32_3 = arith.constant 0 : i32
    return %arg0, %c0_i32, %c0_i32_0, %c0_i32_1, %c0_i32_2 : i32, i32, i32, i32, i32
  }
  func.func @transform_1(%arg0: i32) -> (i32, i32, i32) {
    %c0_i32 = arith.constant 0 : i32
    %c0_i32_0 = arith.constant 0 : i32
    %c0_i32_1 = arith.constant 0 : i32
    %c0_i32_2 = arith.constant 0 : i32
    return %c0_i32, %c0_i32_0, %c0_i32_1 : i32, i32, i32
  }
  func.func @transform_2(%arg0: i32) -> (i32, i32) {
    %c0_i32 = arith.constant 0 : i32
    %c0_i32_0 = arith.constant 0 : i32
    %c0_i32_1 = arith.constant 0 : i32
    return %c0_i32, %c0_i32_0 : i32, i32
  }
  func.func @transform_3(%arg0: i32) -> (i32, i32, i32) {
    %c0_i32 = arith.constant 0 : i32
    %c0_i32_0 = arith.constant 0 : i32
    %c0_i32_1 = arith.constant 0 : i32
    %c0_i32_2 = arith.constant 0 : i32
    return %c0_i32, %c0_i32_0, %c0_i32_1 : i32, i32, i32
  }
  func.func @transform_4(%arg0: i32) -> (i32, i32) {
    %c0_i32 = arith.constant 0 : i32
    %c0_i32_0 = arith.constant 0 : i32
    %c0_i32_1 = arith.constant 0 : i32
    return %c0_i32, %c0_i32_0 : i32, i32
  }
  func.func @transform_5(%arg0: i32) -> (i32, i32, i32) {
    %c0_i32 = arith.constant 0 : i32
    %c0_i32_0 = arith.constant 0 : i32
    %c0_i32_1 = arith.constant 0 : i32
    return %arg0, %c0_i32, %c0_i32_0 : i32, i32, i32
  }
}

</mosaic_0001>

<bundles_post_ra>
// kernel: down_forward.1
= control target key start
LH: loop header
LB: loop body
LE: loop exit
PB: predicated region body
PF: predicated region fallthrough
CT: control target
= control target key end

     0   :  { %s2880_s18 = smov 0   ;;  %s3458_s0 = inlined_call_operand.vmem [shape: f32[2,8,2,8,8], index: 0, kind: input, shape index: {}]   ;;  %s3459_s1 = inlined_call_operand.vmem [shape: bf16[3,12,128], index: 1, kind: input, shape index: {}]   ;;  %s3460_s2 = inlined_call_operand.vmem [shape: f32[1,128], index: 2, kind: input, shape index: {}]   ;;  %s3461_s3 = inlined_call_operand.vmem [shape: bf16[3,384,128], index: 3, kind: input, shape index: {}]   ;;  %s3462_s4 = inlined_call_operand.vmem [shape: f32[1,128], index: 4, kind: input, shape index: {}]   ;;  %s3463_s5 = inlined_call_operand.vmem [shape: f32[2,64,128], index: 5, kind: output, shape index: {}]  }
   0x1 LB: > { %s2137_s19 = sadd.s32 4294967295, %s2844_s18   ;;  %p2141_p0 = scmp.ge.s32.totalorder %s2844_s18, 1  ;;  %s2844_s18 = sphi %s2880_s18, %s15_s18  }
   0x2   : > { %p187_p1 = scmp.lt.s32.totalorder %s2844_s18, 3 }
   0x4   : > { %p188_p2 = pnand %p2141_p0, %p187_p1 }
   0x5   : > { %p215_p3 = scmp.lt.s32.totalorder (!%p188_p2), %s2137_s19, 1  ;;  %s2846_s24 = smov (!%p188_p2), 124   ;;  %vm363_vm0 = vcmask (!%p188_p2), 1040384   ;;  %vm364_vm1 = vsmask.f32 (!%p188_p2), 256  ;;  %vm374_vm2 = vcmask (!%p188_p2), 1044480  }
   0x6   : > { %191 = sbr.rel (%p188_p2) target bundleno = 882 (0x372), region = 40  ;;  %vm375_vm3 = vsmask.f32 (!%p188_p2), 4352  ;;  %vm2896_vm4 = vmand (!%p188_p2), %vm363_vm0, %vm364_vm1  ;;  %s2847_s25 = smov (!%p188_p2), 8   ;;  %vm566_vm6 = vcmask (!%p188_p2), 1045504   ;;  %vm489_vm7 = vcmask (!%p188_p2), 31744  }
   0x7   : > { %vm2902_vm5 = vmand (!%p188_p2), %vm374_vm2, %vm375_vm3  ;;  %s2848_s30 = smov (!%p188_p2), 4   ;;  %vm506_vm8 = vcmask (!%p188_p2), 64512   ;;  %vm553_vm9 = vcmask (!%p188_p2), 97280  }
   0xd   : > { %s3469_s19 = smov (!%p215_p3, %s2137_s19), 1 }
   0xe   : > { %s2381_s20 = sshll.u32 %s3469_s19, 7 }
   0xf   : > { %s219_s23 = scalar_lea.vmem %s3458_s0, %s2381_s20  ;;  %s2382_s20 = sshll.u32 %s3469_s19, 6 }
  0x10   : > { %v226_v0 = vld [vmem:[%s219_s23] sm:$0xff]  ;;  %v227_v1 = vld [vmem:[%s219_s23 + $0x10] sm:$0xff]  ;;  %v2146_v2 = vld [vmem:[%s219_s23 + $0x8] sm:$0xff] }
  0x11   : > { %v2147_v3 = vld [vmem:[%s219_s23 + $0x18] sm:$0xff]  ;;  %v243_v4 = vmax.f32 %v226_v0, %v2146_v2  ;;  %v230_v5 = vld [vmem:[%s219_s23 + $0x40] sm:$0xff]  ;;  %v231_v6 = vld [vmem:[%s219_s23 + $0x50] sm:$0xff] }
  0x12   : > { %v244_v7 = vmax.f32 %v227_v1, %v2147_v3  ;;  %v2150_v8 = vld [vmem:[%s219_s23 + $0x48] sm:$0xff]  ;;  %v2151_v9 = vld [vmem:[%s219_s23 + $0x58] sm:$0xff]  ;;  %v228_v10 = vld [vmem:[%s219_s23 + $0x20] sm:$0xff] }
  0x13   : > { %v247_v11 = vmax.f32 %v230_v5, %v2150_v8  ;;  %v248_v12 = vmax.f32 %v231_v6, %v2151_v9  ;;  %v229_v13 = vld [vmem:[%s219_s23 + $0x30] sm:$0xff]  ;;  %v2148_v14 = vld [vmem:[%s219_s23 + $0x28] sm:$0xff]  ;;  %v2149_v15 = vld [vmem:[%s219_s23 + $0x38] sm:$0xff] }
  0x14   : > { %v2743_v16 = vpack.i.bf16 %v244_v7, %v243_v4  ;;  %v245_v17 = vmax.f32 %v228_v10, %v2148_v14  ;;  %v246_v18 = vmax.f32 %v229_v13, %v2149_v15  ;;  %v232_v19 = vld [vmem:[%s219_s23 + $0x60] sm:$0xff]  ;;  %v233_v20 = vld [vmem:[%s219_s23 + $0x70] sm:$0xff]  ;;  %v2152_v21 = vld [vmem:[%s219_s23 + $0x68] sm:$0xff] }
  0x15   : > { %v2753_v22 = vpack.i.bf16 %v248_v12, %v247_v11  ;;  %v2153_v23 = vld [vmem:[%s219_s23 + $0x78] sm:$0xff]  ;;  %v249_v24 = vmax.f32 %v232_v19, %v2152_v21  ;;  %v2804_v9 = vld [vmem:[%s3461_s3 + $0x1d0] sm:$0xff]   ;;  %s3445_s23 = scalar_lea.vmem %s3463_s5, %s2382_s20 }
  0x16   : > { %2744 = vrot.lane.b32.xlu0 %v2743_v16, %s2846_s24  ;;  %v2748_v25 = vpack.i.bf16 %v246_v18, %v245_v17  ;;  %v250_v26 = vmax.f32 %v233_v20, %v2153_v23 }
  0x17   : > { %2754 = vrot.lane.b32.xlu1 %v2753_v22, %s2846_s24 }
  0x18   : > { %v2758_v27 = vpack.i.bf16 %v250_v26, %v249_v24 }
  0x1a   : > { %2749 = vrot.lane.b32.xlu0 %v2748_v25, %s2846_s24 }
  0x1b   : > { %2759 = vrot.lane.b32.xlu1 %v2758_v27, %s2846_s24 }
  0x88   : > { %v2745_v28 = vpop.permute.xlu0 %2744 }
  0x89   : > { %v2747_v29 = vunpack.i.h.bf16 %v2745_v28  ;;  %v2746_v30 = vunpack.i.l.bf16 %v2745_v28  ;;  %v2755_v31 = vpop.permute.xlu1 %2754 }
  0x8a   : > { %v2757_v32 = vunpack.i.h.bf16 %v2755_v31  ;;  %v2756_v33 = vunpack.i.l.bf16 %v2755_v31 }
  0x8b   : > { %v284_v34 = vmax.f32 %v244_v7, %v2747_v29  ;;  %v283_v35 = vmax.f32 %v243_v4, %v2746_v30  ;;  %v2803_v4 = vld [vmem:[%s3461_s3 + $0x188] sm:$0xff]  }
  0x8c   : > { %v288_v36 = vmax.f32 %v248_v12, %v2757_v32  ;;  %v287_v37 = vmax.f32 %v247_v11, %v2756_v33  ;;  %v2750_v38 = vpop.permute.xlu0 %2749 }
  0x8d   : > { %v292_v39 = vpack.c.bf16 %v284_v34, %v284_v34  ;;  %v291_v40 = vpack.c.bf16 %v283_v35, %v283_v35  ;;  %v2752_v41 = vunpack.i.h.bf16 %v2750_v38  ;;  %v2751_v42 = vunpack.i.l.bf16 %v2750_v38  ;;  %v2760_v43 = vpop.permute.xlu1 %2759 }
  0x8e   : > { %v296_v44 = vpack.c.bf16 %v288_v36, %v288_v36  ;;  %v295_v45 = vpack.c.bf16 %v287_v37, %v287_v37  ;;  %v2762_v46 = vunpack.i.h.bf16 %v2760_v43  ;;  %v2761_v47 = vunpack.i.l.bf16 %v2760_v43 }
  0x8f   : > { %v307_v48 = vshrl.u32 %v292_v39, 16  ;;  %v300_v49 = vshrl.u32 %v291_v40, 16  ;;  %v310_v50 = vshll.u32 %v292_v39, 16  ;;  %v303_v51 = vshll.u32 %v291_v40, 16 }
  0x90   : > { %v335_v52 = vshrl.u32 %v296_v44, 16  ;;  %v328_v53 = vshrl.u32 %v295_v45, 16  ;;  %v286_v56 = vmax.f32 %v246_v18, %v2752_v41  ;;  %v285_v57 = vmax.f32 %v245_v17, %v2751_v42 }
  0x91   : > { %v309_v54 = vrot.slane %v307_v48, 7  ;;  %v302_v55 = vrot.slane %v300_v49, 7  ;;  %v338_v58 = vshll.u32 %v296_v44, 16  ;;  %v331_v59 = vshll.u32 %v295_v45, 16 }
  0x92   : > { %v290_v60 = vmax.f32 %v250_v26, %v2762_v46  ;;  %v289_v61 = vmax.f32 %v249_v24, %v2761_v47  ;;  %v294_v0 = vpack.c.bf16 %v286_v56, %v286_v56  ;;  %v293_v1 = vpack.c.bf16 %v285_v57, %v285_v57 }
  0x93   : > { %v312_v62 = vor.u32 %v310_v50, %v309_v54  ;;  %v305_v63 = vor.u32 %v303_v51, %v302_v55  ;;  %v337_v2 = vrot.slane %v335_v52, 7  ;;  %v330_v3 = vrot.slane %v328_v53, 7  ;;  %v2763_v54 = vld [vmem:[%s3459_s1 + $0x8] sm:$0x3f]  }
  0x94   : > { %v298_v5 = vpack.c.bf16 %v290_v60, %v290_v60  ;;  %v297_v6 = vpack.c.bf16 %v289_v61, %v289_v61  ;;  %v321_v7 = vshrl.u32 %v294_v0, 16  ;;  %v314_v8 = vshrl.u32 %v293_v1, 16  ;;  %2728 = vmatprep.subr.msk.bf16.mxu0 %vm566_vm6, %v2763_v54 }
  0x95   : > { %v324_v10 = vshll.u32 %v294_v0, 16  ;;  %v317_v11 = vshll.u32 %v293_v1, 16  ;;  %v367_v16 = vsel %vm2896_vm4, 0, %v312_v62  ;;  %v366_v17 = vsel %vm2896_vm4, 0, %v305_v63  ;;  %v2981_v0 = vld [vmem:[%s3459_s1] sm:$0x3f]  }
  0x96   : > { %v349_v12 = vshrl.u32 %v298_v5, 16  ;;  %v342_v13 = vshrl.u32 %v297_v6, 16  ;;  %v323_v14 = vrot.slane %v321_v7, 7  ;;  %v316_v15 = vrot.slane %v314_v8, 7 }
  0x97   : > { %v340_v18 = vor.u32 %v338_v58, %v337_v2  ;;  %v333_v19 = vor.u32 %v331_v59, %v330_v3  ;;  %v2912_v20 = vsel %vm2902_vm5, %v367_v16, 0  ;;  %v2916_v21 = vsel %vm2902_vm5, %v366_v17, 0 }
  0x98   : > { %v326_v22 = vor.u32 %v324_v10, %v323_v14  ;;  %v319_v23 = vor.u32 %v317_v11, %v316_v15  ;;  %v466_v24 = vrot.slane %v2912_v20, 1  ;;  %v465_v25 = vrot.slane %v2916_v21, 1 }
  0x99   : > { %v352_v26 = vshll.u32 %v298_v5, 16  ;;  %v345_v27 = vshll.u32 %v297_v6, 16  ;;  %v351_v28 = vrot.slane %v349_v12, 7  ;;  %v344_v29 = vrot.slane %v342_v13, 7 }
  0x9a   : > { %475 = vrot.lane.b32.xlu1 %v466_v24, %s2847_s25  ;;  %473 = vrot.lane.b32.xlu0 %v465_v25, %s2847_s25  ;;  %v369_v30 = vsel %vm2896_vm4, 0, %v326_v22  ;;  %v368_v31 = vsel %vm2896_vm4, 0, %v319_v23  ;;  %v371_v34 = vsel %vm2896_vm4, 0, %v340_v18  ;;  %v370_v37 = vsel %vm2896_vm4, 0, %v333_v19  ;;  %v2767_v25 = vld [vmem:[%s3461_s3 + $0x100] sm:$0xff]  }
  0x9b   : > { %v2928_v32 = vsel %vm2902_vm5, %v369_v30, 0  ;;  %v2932_v33 = vsel %vm2902_vm5, %v368_v31, 0  ;;  %v395_v38 = vshll.u32 %v2912_v20, 16  ;;  %v388_v39 = vshll.u32 %v2916_v21, 16  ;;  %2398 = vmatprep.subr.bf16.mxu1 %v2767_v25  ;;  %v2783_v25 = vld [vmem:[%s3461_s3 + $0x120] sm:$0xff]  }
  0x9c   : > { %v468_v35 = vrot.slane %v2928_v32, 1  ;;  %v467_v36 = vrot.slane %v2932_v33, 1  ;;  %v354_v40 = vor.u32 %v352_v26, %v351_v28  ;;  %v347_v41 = vor.u32 %v345_v27, %v344_v29  ;;  %v2769_v26 = vld [vmem:[%s3461_s3 + $0xc0] sm:$0xff]   ;;  %v2771_v27 = vld [vmem:[%s3461_s3 + $0x108] sm:$0xff]  }
  0x9d   : > { %v2946_v42 = vsel %vm2902_vm5, %v371_v34, 0  ;;  %v2951_v44 = vsel %vm2902_vm5, %v370_v37, 0  ;;  %v409_v45 = vshll.u32 %v2928_v32, 16  ;;  %v397_v47 = vrot.slane %v395_v38, 1  ;;  %2399 = vmatpush3.bf16.msra.mxu1 %v2769_v26  ;;  %v2773_v28 = vld [vmem:[%s3461_s3 + $0xc8] sm:$0xff]   ;;  %v2784_v26 = vld [vmem:[%s3461_s3 + $0x20] sm:$0xff]  }
  0x9e   : > { %479 = vrot.lane.b32.xlu1 %v468_v35, %s2847_s25  ;;  %477 = vrot.lane.b32.xlu0 %v467_v36, %s2847_s25  ;;  %v470_v43 = vrot.slane %v2946_v42, 1  ;;  %v469_v46 = vrot.slane %v2951_v44, 1  ;;  %v390_v48 = vrot.slane %v388_v39, 1  ;;  %v402_v49 = vshll.u32 %v2932_v33, 16 }
  0x9f   : > { %v373_v50 = vsel %vm2896_vm4, 0, %v354_v40  ;;  %v372_v51 = vsel %vm2896_vm4, 0, %v347_v41  ;;  %v393_v52 = vshrl.u32 %v2912_v20, 16  ;;  %v386_v53 = vshrl.u32 %v2916_v21, 16  ;;  %2400 = vmatprep.subr.bf16.mxu1 %v2771_v27  ;;  %v2785_v27 = vld [vmem:[%s3461_s3 + $0xe0] sm:$0xff]  }
  0xa0   : > { %v411_v55 = vrot.slane %v409_v45, 1  ;;  %v423_v56 = vshll.u32 %v2946_v42, 16  ;;  %v404_v59 = vrot.slane %v402_v49, 1  ;;  %v416_v60 = vshll.u32 %v2951_v44, 16 }
  0xa1   : > { %v398_v57 = vor.u32 %v397_v47, %v393_v52  ;;  %v391_v58 = vor.u32 %v390_v48, %v386_v53  ;;  %v407_v61 = vshrl.u32 %v2928_v32, 16  ;;  %v2972_v62 = vsel %vm2902_vm5, %v373_v50, 0  ;;  %2401 = vmatpush3.bf16.msra.mxu1 %v2773_v28  ;;  %v2765_v52 = vld [vmem:[%s3459_s1 + $0x10] sm:$0x3f]   ;;  %v2786_v28 = vld [vmem:[%s3461_s3 + $0x68] sm:$0xff]  }
  0xa2   : > { %483 = vrot.lane.b32.xlu1 %v470_v43, %s2847_s25  ;;  %481 = vrot.lane.b32.xlu0 %v469_v46, %s2847_s25  ;;  %v2976_v63 = vsel %vm2902_vm5, %v372_v51, 0  ;;  %v400_v1 = vshrl.u32 %v2932_v33, 16  ;;  %v568_v2 = vsel %vm566_vm6, %v2763_v54, 0  ;;  %v421_v5 = vshrl.u32 %v2946_v42, 16 }
  0xa3   : > { %v412_v3 = vor.u32 %v411_v55, %v407_v61  ;;  %v425_v6 = vrot.slane %v423_v56, 1  ;;  %v414_v7 = vshrl.u32 %v2951_v44, 16  ;;  %v418_v10 = vrot.slane %v416_v60, 1  ;;  %2555 = vmatpush3.bf16.msra.mxu0 %v568_v2 }
  0xa4   : > { %v405_v8 = vor.u32 %v404_v59, %v400_v1  ;;  %v437_v11 = vshll.u32 %v2972_v62, 16  ;;  %v430_v12 = vshll.u32 %v2976_v63, 16  ;;  %2729 = vmatprep.subr.msk.bf16.mxu0 %vm566_vm6, %v2981_v0  ;;  %v435_v14 = vshrl.u32 %v2972_v62, 16 }
  0xa5   : > { %v426_v13 = vor.u32 %v425_v6, %v421_v5  ;;  %v419_v15 = vor.u32 %v418_v10, %v414_v7  ;;  %v428_v17 = vshrl.u32 %v2976_v63, 16  ;;  %v472_v23 = vrot.slane %v2972_v62, 1  ;;  %v2768_v10 = vld [vmem:[%s3461_s3] sm:$0xff]  }
  0xa6   : > { %443 = vrot.lane.b32.xlu1 %v398_v57, %s2848_s30  ;;  %441 = vrot.lane.b32.xlu0 %v391_v58, %s2848_s30  ;;  %v439_v16 = vrot.slane %v437_v11, 1  ;;  %v432_v18 = vrot.slane %v430_v12, 1  ;;  %v471_v24 = vrot.slane %v2976_v63, 1  ;;  %v659_v51 = vsel %vm566_vm6, %v2981_v0, 0  ;;  %v2770_v11 = vld [vmem:[%s3461_s3 + $0x48] sm:$0xff]  }
  0xa7   : > { %v2772_v12 = vld [vmem:[%s3461_s3 + $0x8] sm:$0xff]  }
  0xa8   : > { %v440_v19 = vor.u32 %v439_v16, %v435_v14  ;;  %v433_v22 = vor.u32 %v432_v18, %v428_v17  ;;  %v2774_v14 = vld [vmem:[%s3461_s3 + $0x50] sm:$0xff]   ;;  %v2778_v18 = vld [vmem:[%s3461_s3 + $0x58] sm:$0xff]  }
  0xa9   : > { %v2776_v16 = vld [vmem:[%s3461_s3 + $0x10] sm:$0xff]  }
  0xaa   : > { %447 = vrot.lane.b32.xlu1 %v412_v3, %s2848_s30  ;;  %445 = vrot.lane.b32.xlu0 %v405_v8, %s2848_s30  ;;  %v2849_v3 = vmov 0   ;;  %v2777_v17 = vld [vmem:[%s3461_s3 + $0xd0] sm:$0xff]  }
  0xae   : > { %451 = vrot.lane.b32.xlu1 %v426_v13, %s2848_s30  ;;  %449 = vrot.lane.b32.xlu0 %v419_v15, %s2848_s30  ;;  %v2775_v15 = vld [vmem:[%s3461_s3 + $0x110] sm:$0xff]  }
  0xaf   : > { %2402 = vmatprep.subr.bf16.mxu1 %v2775_v15 }
  0xb0   : > { %2403 = vmatpush3.bf16.msra.mxu1 %v2777_v17 }
  0xb2   : > { %455 = vrot.lane.b32.xlu1 %v440_v19, %s2848_s30  ;;  %453 = vrot.lane.b32.xlu0 %v433_v22, %s2848_s30  ;;  %v2779_v19 = vld [vmem:[%s3461_s3 + $0x118] sm:$0xff]  }
  0xb3   : > { %v2780_v22 = vld [vmem:[%s3461_s3 + $0x18] sm:$0xff]   ;;  %2404 = vmatprep.subr.bf16.mxu1 %v2779_v19 }
  0xb6   : > { %487 = vrot.lane.b32.xlu1 %v472_v23, %s2847_s25  ;;  %485 = vrot.lane.b32.xlu0 %v471_v24, %s2847_s25  ;;  %v2781_v23 = vld [vmem:[%s3461_s3 + $0xd8] sm:$0xff]   ;;  %v2782_v24 = vld [vmem:[%s3461_s3 + $0x60] sm:$0xff]  }
  0xb7   : > { %2405 = vmatpush3.bf16.msra.mxu1 %v2781_v23 }
  0xb8   : > { %2406 = vmatprep.subr.bf16.mxu1 %v2783_v25 }
  0xbb   : > { %2407 = vmatpush3.bf16.msra.mxu1 %v2785_v27 }
 0x10c   : > { %v476_v29 = vpop.permute.xlu1 %475  ;;  %v474_v30 = vpop.permute.xlu0 %473 }
 0x110   : > { %v480_v31 = vpop.permute.xlu1 %479  ;;  %v478_v34 = vpop.permute.xlu0 %477 }
 0x114   : > { %v484_v35 = vpop.permute.xlu1 %483  ;;  %v482_v36 = vpop.permute.xlu0 %481 }
 0x118   : > { %v444_v37 = vpop.permute.xlu1 %443  ;;  %v442_v38 = vpop.permute.xlu0 %441 }
 0x119   : > { %v493_v39 = vsel %vm489_vm7, %v2912_v20, %v444_v37  ;;  %v491_v40 = vsel %vm489_vm7, %v2916_v21, %v442_v38  ;;  %v2793_v37 = vld [vmem:[%s3461_s3 + $0xf0] sm:$0xff]   ;;  %v2794_v38 = vld [vmem:[%s3461_s3 + $0x78] sm:$0xff]  }
 0x11a   : > { %v508_v41 = vsel %vm506_vm8, %v491_v40, %v474_v30  ;;  %v510_v43 = vsel %vm506_vm8, %v493_v39, %v476_v29  ;;  %v2787_v29 = vld [vmem:[%s3461_s3 + $0x128] sm:$0xff]   ;;  %v2795_v39 = vld [vmem:[%s3461_s3 + $0x138] sm:$0xff]  }
 0x11b   : > { %v2156_v45 = vcombine.low %v508_v41, %v510_v43  ;;  %v2165_v5 = vcombine.low %v2849_v3, %v508_v41  ;;  %v2788_v30 = vld [vmem:[%s3461_s3 + $0x28] sm:$0xff]   ;;  %2408 = vmatprep.subr.bf16.mxu1 %v2787_v29  ;;  %v2796_v40 = vld [vmem:[%s3461_s3 + $0x38] sm:$0xff]  }
 0x11c   : > { %v448_v46 = vpop.permute.xlu1 %447  ;;  %v446_v47 = vpop.permute.xlu0 %445  ;;  %v2797_v41 = vld [vmem:[%s3461_s3 + $0xf8] sm:$0xff]  }
 0x11d   : > { %v497_v48 = vsel %vm489_vm7, %v2928_v32, %v448_v46  ;;  %v495_v49 = vsel %vm489_vm7, %v2932_v33, %v446_v47  ;;  %2556 = vmatprep.mubr.msk.bf16.mxu0 %vm553_vm9, %v2156_v45  ;;  %v3145_v45 = vld [vmem:[%s3461_s3 + $0x140] sm:$0xff]  }
 0x11e   : > { %v514_v20 = vsel %vm506_vm8, %v497_v48, %v480_v31  ;;  %v512_v21 = vsel %vm506_vm8, %v495_v49, %v478_v34  ;;  %v2789_v31 = vld [vmem:[%s3461_s3 + $0xe8] sm:$0xff]   ;;  %v2790_v34 = vld [vmem:[%s3461_s3 + $0x70] sm:$0xff]   ;;  %v2182_v46 = vld [vmem:[%s3460_s2] ss:$0 sm:$0xff] }
 0x11f   : > { %v2157_v50 = vcombine.low %v512_v21, %v514_v20  ;;  %v2166_v6 = vcombine.low %v510_v43, %v512_v21  ;;  %2409 = vmatpush3.bf16.msra.mxu1 %v2789_v31  ;;  %v2798_v43 = vld [vmem:[%s3461_s3 + $0x1c0] sm:$0xff]  }
 0x120   : > { %v452_v53 = vpop.permute.xlu1 %451  ;;  %v450_v54 = vpop.permute.xlu0 %449 }
 0x121   : > { %v501_v32 = vsel %vm489_vm7, %v2946_v42, %v452_v53  ;;  %v499_v33 = vsel %vm489_vm7, %v2951_v44, %v450_v54  ;;  %2557 = vmatmul.mubr.msk.bf16.vlgmr.msra.gmra.mrb[0].mxu0 %vm553_vm9, %v2157_v50 }
 0x122   : > { %v518_v55 = vsel %vm506_vm8, %v501_v32, %v484_v35  ;;  %v516_v56 = vsel %vm506_vm8, %v499_v33, %v482_v36  ;;  %2565 = vmatpush3.bf16.msra.mxu0 %v659_v51  ;;  %v2791_v35 = vld [vmem:[%s3461_s3 + $0x130] sm:$0xff]  }
 0x123   : > { %v2158_v57 = vcombine.low %v516_v56, %v518_v55  ;;  %2730 = vmatprep.subr.msk.bf16.mxu0 %vm566_vm6, %v2765_v52  ;;  %v2167_v7 = vcombine.low %v514_v20, %v516_v56  ;;  %v2792_v36 = vld [vmem:[%s3461_s3 + $0x30] sm:$0xff]   ;;  %2410 = vmatprep.subr.bf16.mxu1 %v2791_v35 }
 0x124   : > { %v456_v58 = vpop.permute.xlu1 %455  ;;  %v454_v59 = vpop.permute.xlu0 %453  ;;  %2411 = vmatpush3.bf16.msra.mxu1 %v2793_v37 }
 0x125   : > { %2560 = vmatprep.mubr.msk.bf16.mxu0 %vm553_vm9, %v2158_v57  ;;  %v505_v42 = vsel %vm489_vm7, %v2972_v62, %v456_v58  ;;  %v503_v44 = vsel %vm489_vm7, %v2976_v63, %v454_v59  ;;  %v739_v62 = vsel %vm566_vm6, %v2765_v52, 0  ;;  %v2766_v63 = vld [vmem:[%s3461_s3 + $0x40] sm:$0xff]   ;;  %2412 = vmatprep.subr.bf16.mxu1 %v2795_v39 }
 0x128   : > { %v488_v60 = vpop.permute.xlu1 %487  ;;  %v486_v61 = vpop.permute.xlu0 %485  ;;  %2413 = vmatpush3.bf16.msra.mxu1 %v2797_v41 }
 0x129   : > { %v522_v0 = vsel %vm506_vm8, %v505_v42, %v488_v60  ;;  %v520_v1 = vsel %vm506_vm8, %v503_v44, %v486_v61  ;;  %2584 = vmatprep.subr.bf16.mxu1 %v3145_v45 }
 0x12a   : > { %v2159_v2 = vcombine.low %v520_v1, %v522_v0  ;;  %v2168_v8 = vcombine.low %v518_v55, %v520_v1  ;;  %v2176_v13 = vcombine.low %v522_v0, %v2849_v3 }
 0x12c   : > { %2561 = vmatmul.mubr.msk.bf16.gmra.mrb[4].mxu0 %vm553_vm9, %v2159_v2 }
 0x12d   : > { %2566 = vmatprep.mubr.msk.bf16.mxu0 %vm553_vm9, %v2165_v5 }
 0x134   : > { %2567 = vmatmul.mubr.msk.bf16.vlgmr.msra.gmra.mrb[0].mxu0 %vm553_vm9, %v2166_v6 }
 0x135   : > { %2575 = vmatpush3.bf16.msra.mxu0 %v739_v62  ;;  %2570 = vmatprep.mubr.msk.bf16.mxu0 %vm553_vm9, %v2167_v7 }
 0x136   : > { %2450 = vmatprep.subr.bf16.mxu0 %v2766_v63 }
 0x13c   : > { %2571 = vmatmul.mubr.msk.bf16.gmra.mrb[4].mxu0 %vm553_vm9, %v2168_v8 }
 0x13d   : > { %2576 = vmatprep.mubr.msk.bf16.mxu0 %vm553_vm9, %v2166_v6 }
 0x144   : > { %2577 = vmatmul.mubr.msk.bf16.vlgmr.msra.gmra.mrb[0].mxu0 %vm553_vm9, %v2167_v7 }
 0x145   : > { %2580 = vmatprep.mubr.msk.bf16.mxu0 %vm553_vm9, %v2168_v8  ;;  %2451 = vmatpush3.bf16.msra.mxu0 %v2768_v10 }
 0x146   : > { %2452 = vmatprep.subr.bf16.mxu0 %v2770_v11 }
 0x149   : > { %2453 = vmatpush3.bf16.msra.mxu0 %v2772_v12 }
 0x14a   : > { %2454 = vmatprep.subr.bf16.mxu0 %v2774_v14 }
 0x14c   : > { %2581 = vmatmul.mubr.msk.bf16.gmra.mrb[4].mxu0 %vm553_vm9, %v2176_v13 }
 0x14d   : > { %2455 = vmatpush3.bf16.msra.mxu0 %v2776_v16 }
 0x14e   : > { %2456 = vmatprep.subr.bf16.mxu0 %v2778_v18 }
 0x151   : > { %2457 = vmatpush3.bf16.msra.mxu0 %v2780_v22 }
 0x152   : > { %2458 = vmatprep.subr.bf16.mxu0 %v2782_v24 }
 0x155   : > { %2459 = vmatpush3.bf16.msra.mxu0 %v2784_v26 }
 0x156   : > { %2460 = vmatprep.subr.bf16.mxu0 %v2786_v28 }
 0x159   : > { %2461 = vmatpush3.bf16.msra.mxu0 %v2788_v30 }
 0x15a   : > { %2462 = vmatprep.subr.bf16.mxu0 %v2790_v34 }
 0x15d   : > { %2463 = vmatpush3.bf16.msra.mxu0 %v2792_v36 }
 0x15e   : > { %2464 = vmatprep.subr.bf16.mxu0 %v2794_v38 }
 0x161   : > { %2465 = vmatpush3.bf16.msra.mxu0 %v2796_v40 }
 0x162   : > { %2502 = vmatprep.subr.bf16.mxu0 %v2798_v43 }
 0x217   : > { %v2578_v47 = vpop.f32.mrb[0].mxu0 }
 0x218   : > { %v823_v48 = vadd.f32 %v2578_v47, %v2182_v46  ;;  %v775_v49 = vpop.f32.mrb[1].mxu0 }
 0x219   : > { %v821_v20 = vadd.f32 %v2182_v46, %v775_v49  ;;  %v2579_v21 = vpop.f32.mrb[2].mxu0 }
 0x21a   : > { %v831_v50 = vmax.f32 %v823_v48, 0.0  ;;  %v824_v51 = vadd.f32 %v2579_v21, %v2182_v46  ;;  %v778_v52 = vpop.f32.mrb[3].mxu0 }
 0x21b   : > { %v829_v53 = vmax.f32 %v821_v20, 0.0  ;;  %v822_v54 = vadd.f32 %v2182_v46, %v778_v52 }
 0x21c   : > { %v839_v32 = vpack.c.bf16 %v831_v50, %v831_v50  ;;  %v832_v33 = vmax.f32 %v824_v51, 0.0 }
 0x21d   : > { %v837_v55 = vpack.c.bf16 %v829_v53, %v829_v53  ;;  %v830_v56 = vmax.f32 %v822_v54, 0.0 }
 0x21e   : > { %v860_v57 = vshrl.u32 %v839_v32, 16  ;;  %v840_v58 = vpack.c.bf16 %v832_v33, %v832_v33  ;;  %v863_v59 = vshll.u32 %v839_v32, 16 }
 0x21f   : > { %v846_v42 = vshrl.u32 %v837_v55, 16  ;;  %v849_v44 = vshll.u32 %v837_v55, 16  ;;  %v838_v60 = vpack.c.bf16 %v830_v56, %v830_v56  ;;  %v2582_v61 = vpop.f32.mrb[4].mxu0 }
 0x220   : > { %v862_v0 = vrot.slane %v860_v57, 7  ;;  %v867_v1 = vshrl.u32 %v840_v58, 16  ;;  %v870_v2 = vshll.u32 %v840_v58, 16  ;;  %v827_v5 = vadd.f32 %v2582_v61, %v2182_v46  ;;  %v791_v6 = vpop.f32.mrb[5].mxu0 }
 0x221   : > { %v848_v62 = vrot.slane %v846_v42, 7  ;;  %v853_v63 = vshrl.u32 %v838_v60, 16  ;;  %v856_v7 = vshll.u32 %v838_v60, 16  ;;  %v825_v8 = vadd.f32 %v2182_v46, %v791_v6  ;;  %v2583_v10 = vpop.f32.mrb[6].mxu0 }
 0x222   : > { %v865_v11 = vor.u32 %v863_v59, %v862_v0  ;;  %v869_v12 = vrot.slane %v867_v1, 7  ;;  %v835_v13 = vmax.f32 %v827_v5, 0.0  ;;  %v828_v14 = vadd.f32 %v2583_v10, %v2182_v46  ;;  %v794_v15 = vpop.f32.mrb[7].mxu0 }
 0x223   : > { %v851_v16 = vor.u32 %v849_v44, %v848_v62  ;;  %v855_v17 = vrot.slane %v853_v63, 7  ;;  %v833_v18 = vmax.f32 %v825_v8, 0.0  ;;  %v826_v19 = vadd.f32 %v2182_v46, %v794_v15  ;;  %v2800_v63 = vld [vmem:[%s3461_s3 + $0x180] sm:$0xff]  }
 0x224   : > { %v911_v22 = vsel %vm2896_vm4, 0, %v865_v11  ;;  %v872_v23 = vor.u32 %v870_v2, %v869_v12  ;;  %v843_v24 = vpack.c.bf16 %v835_v13, %v835_v13  ;;  %v836_v25 = vmax.f32 %v828_v14, 0.0  ;;  %v2801_v13 = vld [vmem:[%s3461_s3 + $0x1c8] sm:$0xff]  }
 0x225   : > { %v3155_v26 = vsel %vm2902_vm5, %v911_v22, 0  ;;  %v909_v27 = vsel %vm2896_vm4, 0, %v851_v16  ;;  %v858_v28 = vor.u32 %v856_v7, %v855_v17  ;;  %v841_v29 = vpack.c.bf16 %v833_v18, %v833_v18  ;;  %v2802_v22 = vld [vmem:[%s3461_s3 + $0x148] sm:$0xff]  }
 0x226   : > { %v3161_v30 = vsel %vm2902_vm5, %v909_v27, 0  ;;  %v912_v31 = vsel %vm2896_vm4, 0, %v872_v23  ;;  %v888_v34 = vshrl.u32 %v843_v24, 16  ;;  %v891_v35 = vshll.u32 %v843_v24, 16 }
 0x227   : > { %v3167_v36 = vsel %vm2902_vm5, %v912_v31, 0  ;;  %v910_v37 = vsel %vm2896_vm4, 0, %v858_v28  ;;  %v874_v38 = vshrl.u32 %v841_v29, 16  ;;  %v877_v39 = vshll.u32 %v841_v29, 16 }
 0x228   : > { %v3173_v40 = vsel %vm2902_vm5, %v910_v37, 0  ;;  %v890_v41 = vrot.slane %v888_v34, 7  ;;  %v844_v43 = vpack.c.bf16 %v836_v25, %v836_v25  ;;  %v834_v46 = vmax.f32 %v826_v19, 0.0 }
 0x229   : > { %v876_v47 = vrot.slane %v874_v38, 7  ;;  %v926_v48 = vshrl.u32 %v3161_v30, 16  ;;  %v928_v49 = vshll.u32 %v3161_v30, 16  ;;  %v2267_v20 = vcombine.low %v2849_v3, %v3161_v30 }
 0x22a   : > { %v893_v21 = vor.u32 %v891_v35, %v890_v41  ;;  %v895_v50 = vshrl.u32 %v844_v43, 16  ;;  %v898_v51 = vshll.u32 %v844_v43, 16  ;;  %v842_v52 = vpack.c.bf16 %v834_v46, %v834_v46 }
 0x22b   : > { %v879_v53 = vor.u32 %v877_v39, %v876_v47  ;;  %v930_v54 = vrot.slane %v928_v49, 1  ;;  %v933_v32 = vshrl.u32 %v3173_v40, 16  ;;  %v935_v33 = vshll.u32 %v3173_v40, 16  ;;  %v2805_v47 = vld [vmem:[%s3461_s3 + $0x150] sm:$0xff]  }
 0x22c   : > { %v915_v55 = vsel %vm2896_vm4, 0, %v893_v21  ;;  %v897_v56 = vrot.slane %v895_v50, 7  ;;  %v881_v57 = vshrl.u32 %v842_v52, 16  ;;  %v884_v58 = vshll.u32 %v842_v52, 16 }
 0x22d   : > { %v3185_v59 = vsel %vm2902_vm5, %v915_v55, 0  ;;  %v913_v42 = vsel %vm2896_vm4, 0, %v879_v53  ;;  %v931_v44 = vor.u32 %v930_v54, %v926_v48  ;;  %v937_v60 = vrot.slane %v935_v33, 1 }
 0x22e   : > { %v3191_v61 = vsel %vm2902_vm5, %v913_v42, 0  ;;  %v900_v0 = vor.u32 %v898_v51, %v897_v56  ;;  %v883_v1 = vrot.slane %v881_v57, 7  ;;  %v940_v2 = vshrl.u32 %v3155_v26, 16 }
 0x22f   : > { %v2268_v5 = vcombine.low %v2849_v3, %v931_v44  ;;  %v938_v6 = vor.u32 %v937_v60, %v933_v32  ;;  %v942_v62 = vshll.u32 %v3155_v26, 16  ;;  %v2231_v7 = vcombine.low %v3161_v30, %v3173_v40  ;;  %v2807_v32 = vld [vmem:[%s3461_s3 + $0x1d8] sm:$0xff]  }
 0x230   : > { %v916_v8 = vsel %vm2896_vm4, 0, %v900_v0  ;;  %v886_v10 = vor.u32 %v884_v58, %v883_v1  ;;  %v947_v11 = vshrl.u32 %v3167_v36, 16  ;;  %v949_v12 = vshll.u32 %v3167_v36, 16  ;;  %v2808_v60 = vld [vmem:[%s3461_s3 + $0x158] sm:$0xff]  }
 0x231   : > { %v3210_v14 = vsel %vm2902_vm5, %v916_v8, 0  ;;  %1616 = vmatprep.mubr.bf16.mxu0 %v2268_v5  ;;  %v2232_v15 = vcombine.low %v931_v44, %v938_v6  ;;  %v944_v16 = vrot.slane %v942_v62, 1  ;;  %v3214_v17 = vcombine.low %v3173_v40, %v3155_v26 }
 0x232   : > { %v914_v18 = vsel %vm2896_vm4, 0, %v886_v10  ;;  %1617 = vmatmul.mubr.bf16.vlgmr.msra.gmra.mrb[8].mxu0 %v2267_v20  ;;  %v951_v19 = vrot.slane %v949_v12, 1  ;;  %v954_v23 = vshrl.u32 %v3191_v61, 16  ;;  %v956_v24 = vshll.u32 %v3191_v61, 16 }
 0x233   : > { %v3225_v25 = vsel %vm2902_vm5, %v914_v18, 0  ;;  %1318 = vmatprep.mubr.bf16.mxu1 %v2232_v15  ;;  %v945_v27 = vor.u32 %v944_v16, %v940_v2  ;;  %2503 = vmatpush3.bf16.msra.mxu0 %v2800_v63  ;;  %v2234_v28 = vcombine.low %v3155_v26, %v3167_v36  ;;  %v3234_v29 = vcombine.low %v3167_v36, %v3191_v61  ;;  %v2812_v16 = vld [vmem:[%s3461_s3 + $0x1a0] sm:$0xff]   ;;  %v2813_v18 = vld [vmem:[%s3461_s3 + $0x1e8] sm:$0xff]  }
 0x234   : > { %1319 = vmatmul.mubr.bf16.vlgmr.msra.gmra.mrb[0].mxu1 %v2231_v7  ;;  %v952_v31 = vor.u32 %v951_v19, %v947_v11  ;;  %2504 = vmatprep.subr.bf16.mxu0 %v2801_v13  ;;  %v958_v34 = vrot.slane %v956_v24, 1  ;;  %v961_v35 = vshrl.u32 %v3225_v25, 16  ;;  %v963_v37 = vshll.u32 %v3225_v25, 16  ;;  %v2811_v11 = vld [vmem:[%s3461_s3 + $0x160] sm:$0xff]   ;;  %v2814_v19 = vld [vmem:[%s3461_s3 + $0x168] sm:$0xff]   ;;  %v2817_v24 = vld [vmem:[%s3461_s3 + $0x170] sm:$0xff]  }
 0x235   : > { %v3241_v38 = vcombine.low %v938_v6, %v945_v27  ;;  %2585 = vmatpush3.bf16.msra.mxu1 %v3145_v45  ;;  %v968_v39 = vshrl.u32 %v3185_v59, 16  ;;  %v970_v41 = vshll.u32 %v3185_v59, 16  ;;  %v2237_v43 = vcombine.low %v3191_v61, %v3225_v25  ;;  %v2806_v45 = vld [vmem:[%s3461_s3 + $0x190] sm:$0xff]   ;;  %v2810_v6 = vld [vmem:[%s3461_s3 + $0x1e0] sm:$0xff]  }
 0x236   : > { %v2235_v46 = vcombine.low %v945_v27, %v952_v31  ;;  %2586 = vmatprep.subr.bf16.mxu1 %v2802_v22  ;;  %v959_v48 = vor.u32 %v958_v34, %v954_v23  ;;  %v965_v49 = vrot.slane %v963_v37, 1  ;;  %v975_v20 = vshrl.u32 %v3210_v14, 16  ;;  %v2816_v23 = vld [vmem:[%s3461_s3 + $0x1f0] sm:$0xff]   ;;  %v2829_v37 = vld [vmem:[%s3461_s3 + $0x98] sm:$0xff]  }
 0x237   : > { %1624 = vmatprep.mubr.bf16.mxu0 %v3241_v38  ;;  %2505 = vmatpush3.bf16.msra.mxu0 %v2803_v4  ;;  %v972_v21 = vrot.slane %v970_v41, 1  ;;  %v977_v50 = vshll.u32 %v3210_v14, 16  ;;  %v3259_v51 = vcombine.low %v3225_v25, %v3185_v59  ;;  %v2240_v52 = vcombine.low %v3185_v59, %v3210_v14  ;;  %v2818_v27 = vld [vmem:[%s3461_s3 + $0x1b0] sm:$0xff]   ;;  %v2821_v4 = vld [vmem:[%s3461_s3 + $0x1b8] sm:$0xff]  }
 0x238   : > { %1326 = vmatprep.mubr.bf16.mxu1 %v2235_v46  ;;  %2506 = vmatprep.subr.bf16.mxu0 %v2804_v9  ;;  %v3263_v53 = vcombine.low %v952_v31, %v959_v48  ;;  %v966_v54 = vor.u32 %v965_v49, %v961_v35  ;;  %v989_v33 = vrot.slane %v3161_v30, 1  ;;  %v990_v55 = vrot.slane %v3173_v40, 1  ;;  %v2823_v31 = vld [vmem:[%s3461_s3 + $0x80] sm:$0xff]   ;;  %v2825_v9 = vld [vmem:[%s3461_s3 + $0x88] sm:$0xff]   ;;  %v2826_v34 = vld [vmem:[%s3461_s3 + $0x210] sm:$0xff]  }
 0x239   : > { %2587 = vmatpush3.bf16.msra.mxu1 %v2802_v22  ;;  %v973_v56 = vor.u32 %v972_v21, %v968_v39  ;;  %v979_v57 = vrot.slane %v977_v50, 1  ;;  %v991_v58 = vrot.slane %v3155_v26, 1  ;;  %v992_v42 = vrot.slane %v3167_v36, 1  ;;  %v2809_v26 = vld [vmem:[%s3461_s3 + $0x198] sm:$0xff]   ;;  %v2815_v22 = vld [vmem:[%s3461_s3 + $0x1a8] sm:$0xff]   ;;  %v2830_v39 = vld [vmem:[%s3461_s3 + $0x220] sm:$0xff]  }
 0x23a   : > { %1625 = vmatmul.mubr.bf16.gmra.mrb[12].mxu0 %v3214_v17  ;;  %2588 = vmatprep.subr.bf16.mxu1 %v2805_v47  ;;  %v2238_v44 = vcombine.low %v959_v48, %v966_v54  ;;  %v2233_v0 = vcombine.low %v989_v33, %v990_v55  ;;  %v993_v40 = vrot.slane %v3191_v61, 1  ;;  %v994_v1 = vrot.slane %v3225_v25, 1  ;;  %v2819_v61 = vld [vmem:[%s3461_s3 + $0x1f8] sm:$0xff]   ;;  %v2832_v30 = vld [vmem:[%s3461_s3 + $0x228] sm:$0xff]   ;;  %v2834_v46 = vld [vmem:[%s3461_s3 + $0x230] sm:$0xff]  }
 0x23b   : > { %1632 = vmatprep.mubr.bf16.mxu0 %v3263_v53  ;;  %2507 = vmatpush3.bf16.msra.mxu0 %v2806_v45  ;;  %v3284_v36 = vcombine.low %v966_v54, %v973_v56  ;;  %v3286_v2 = vor.u32 %v979_v57, %v975_v20  ;;  %v2236_v5 = vcombine.low %v991_v58, %v992_v42  ;;  %v995_v7 = vrot.slane %v3185_v59, 1  ;;  %v2820_v25 = vld [vmem:[%s3461_s3 + $0x178] sm:$0xff]   ;;  %v3359_v59 = vld [vmem:[%s3461_s3 + $0x208] sm:$0xff]  }
 0x23c   : > { %1327 = vmatmul.mubr.bf16.gmra.mrb[4].mxu1 %v2234_v28  ;;  %2508 = vmatprep.subr.bf16.mxu0 %v2807_v32  ;;  %v2239_v62 = vcombine.low %v993_v40, %v994_v1  ;;  %v3291_v63 = vcombine.low %v992_v42, %v993_v40  ;;  %v996_v8 = vrot.slane %v3210_v14, 1  ;;  %v3303_v13 = vcombine.low %v990_v55, %v991_v58  ;;  %v3350_v28 = vld [vmem:[%s3461_s3 + $0x200] sm:$0xff]   ;;  %v2828_v35 = vld [vmem:[%s3461_s3 + $0x218] sm:$0xff]  }
 0x23d   : > { %2589 = vmatpush3.bf16.msra.mxu1 %v2805_v47  ;;  %1334 = vmatprep.mubr.bf16.mxu1 %v2238_v44  ;;  %v2241_v10 = vcombine.low %v973_v56, %v3286_v2  ;;  %v3305_v15 = vcombine.low %v994_v1, %v995_v7  ;;  %v2352_v41 = vcombine.low %v3286_v2, %v2849_v3  ;;  %v2835_v47 = vld [vmem:[%s3461_s3 + $0xb0] sm:$0xff]   ;;  %v2836_v49 = vld [vmem:[%s3461_s3 + $0x238] sm:$0xff]  }
 0x23e   : > { %2590 = vmatprep.subr.bf16.mxu1 %v2808_v60  ;;  %v3301_v12 = vcombine.low %v995_v7, %v996_v8  ;;  %v2351_v48 = vcombine.low %v3210_v14, %v2849_v3  ;;  %v2837_v20 = vld [vmem:[%s3461_s3 + $0xb8] sm:$0xff]   ;;  %v2353_v45 = vcombine.low %v996_v8, %v2849_v3 }
 0x23f   : > { %2509 = vmatpush3.bf16.msra.mxu0 %v2809_v26 }
 0x240   : > { %2510 = vmatprep.subr.bf16.mxu0 %v2810_v6 }
 0x241   : > { %2591 = vmatpush3.bf16.msra.mxu1 %v2808_v60 }
 0x242   : > { %1633 = vmatmul.mubr.bf16.gmra.mrb[16].mxu0 %v3234_v29  ;;  %2592 = vmatprep.subr.bf16.mxu1 %v2811_v11 }
 0x243   : > { %1640 = vmatprep.mubr.bf16.mxu0 %v3284_v36  ;;  %2511 = vmatpush3.bf16.msra.mxu0 %v2812_v16 }
 0x244   : > { %1335 = vmatmul.mubr.bf16.gmra.mrb[8].mxu1 %v2237_v43  ;;  %2512 = vmatprep.subr.bf16.mxu0 %v2813_v18  ;;  %v2833_v43 = vld [vmem:[%s3461_s3 + $0xa8] sm:$0xff]  }
 0x245   : > { %2593 = vmatpush3.bf16.msra.mxu1 %v2811_v11  ;;  %1342 = vmatprep.mubr.bf16.mxu1 %v2241_v10 }
 0x246   : > { %2594 = vmatprep.subr.bf16.mxu1 %v2814_v19 }
 0x247   : > { %2513 = vmatpush3.bf16.msra.mxu0 %v2815_v22 }
 0x248   : > { %2514 = vmatprep.subr.bf16.mxu0 %v2816_v23 }
 0x249   : > { %2595 = vmatpush3.bf16.msra.mxu1 %v2814_v19 }
 0x24a   : > { %1641 = vmatmul.mubr.bf16.gmra.mrb[20].mxu0 %v3259_v51  ;;  %2596 = vmatprep.subr.bf16.mxu1 %v2817_v24 }
 0x24b   : > { %2515 = vmatpush3.bf16.msra.mxu0 %v2818_v27  ;;  %1945 = vmatprep.mubr.bf16.mxu0 %v3241_v38  ;;  %v2269_v38 = vcombine.low %v2849_v3, %v989_v33 }
 0x24c   : > { %1343 = vmatmul.mubr.bf16.gmra.mrb[12].mxu1 %v2240_v52  ;;  %2516 = vmatprep.subr.bf16.mxu0 %v2819_v61 }
 0x24d   : > { %2597 = vmatpush3.bf16.msra.mxu1 %v2817_v24  ;;  %2600 = vmatprep.mubr.bf16.mxu1 %v2233_v0 }
 0x24e   : > { %2598 = vmatprep.subr.bf16.mxu1 %v2820_v25 }
 0x24f   : > { %2517 = vmatpush3.bf16.msra.mxu0 %v2821_v4 }
 0x250   : > { %2632 = vmatprep.subr.bf16.mxu0 %v3350_v28 }
 0x251   : > { %2599 = vmatpush3.bf16.msra.mxu1 %v2820_v25 }
 0x252   : > { %1946 = vmatmul.mubr.bf16.vlgmr.msra.gmra.mrb[24].mxu0 %v3214_v17  ;;  %2608 = vmatprep.subr.bf16.mxu1 %v2823_v31  ;;  %v2827_v17 = vld [vmem:[%s3461_s3 + $0x90] sm:$0xff]  }
 0x253   : > { %1953 = vmatprep.mubr.bf16.mxu0 %v3263_v53  ;;  %2633 = vmatpush3.bf16.msra.mxu0 %v3350_v28 }
 0x254   : > { %2601 = vmatmul.mubr.bf16.vlgmr.msra.gmra.mrb[16].mxu1 %v2236_v5  ;;  %2634 = vmatprep.subr.bf16.mxu0 %v3359_v59 }
 0x255   : > { %2609 = vmatpush3.bf16.msra.mxu1 %v2823_v31  ;;  %2604 = vmatprep.mubr.bf16.mxu1 %v2239_v62 }
 0x256   : > { %2610 = vmatprep.subr.bf16.mxu1 %v2825_v9 }
 0x257   : > { %2635 = vmatpush3.bf16.msra.mxu0 %v3359_v59 }
 0x258   : > { %2636 = vmatprep.subr.bf16.mxu0 %v2826_v34 }
 0x259   : > { %2611 = vmatpush3.bf16.msra.mxu1 %v2825_v9 }
 0x25a   : > { %1954 = vmatmul.mubr.bf16.gmra.mrb[28].mxu0 %v3234_v29  ;;  %2612 = vmatprep.subr.bf16.mxu1 %v2827_v17  ;;  %v2831_v29 = vld [vmem:[%s3461_s3 + $0xa0] sm:$0xff]  }
 0x25b   : > { %1961 = vmatprep.mubr.bf16.mxu0 %v3284_v36  ;;  %2637 = vmatpush3.bf16.msra.mxu0 %v2826_v34 }
 0x25c   : > { %2605 = vmatmul.mubr.bf16.gmra.mrb[20].mxu1 %v3301_v12  ;;  %2638 = vmatprep.subr.bf16.mxu0 %v2828_v35 }
 0x25d   : > { %2613 = vmatpush3.bf16.msra.mxu1 %v2827_v17  ;;  %2624 = vmatprep.mubr.bf16.mxu1 %v2269_v38 }
 0x25e   : > { %2614 = vmatprep.subr.bf16.mxu1 %v2829_v37 }
 0x25f   : > { %2639 = vmatpush3.bf16.msra.mxu0 %v2828_v35 }
 0x260   : > { %2640 = vmatprep.subr.bf16.mxu0 %v2830_v39 }
 0x261   : > { %2615 = vmatpush3.bf16.msra.mxu1 %v2829_v37 }
 0x262   : > { %1962 = vmatmul.mubr.bf16.gmra.mrb[32].mxu0 %v3259_v51  ;;  %2616 = vmatprep.subr.bf16.mxu1 %v2831_v29 }
 0x263   : > { %1969 = vmatprep.mubr.bf16.mxu0 %v2352_v41  ;;  %2641 = vmatpush3.bf16.msra.mxu0 %v2830_v39 }
 0x264   : > { %2642 = vmatprep.subr.bf16.mxu0 %v2832_v30 }
 0x265   : > { %2617 = vmatpush3.bf16.msra.mxu1 %v2831_v29 }
 0x266   : > { %2618 = vmatprep.subr.bf16.mxu1 %v2833_v43 }
 0x267   : > { %2643 = vmatpush3.bf16.msra.mxu0 %v2832_v30 }
 0x268   : > { %2644 = vmatprep.subr.bf16.mxu0 %v2834_v46 }
 0x269   : > { %2619 = vmatpush3.bf16.msra.mxu1 %v2833_v43 }
 0x26a   : > { %1970 = vmatmul.mubr.bf16.gmra.mrb[36].mxu0 %v2351_v48  ;;  %2620 = vmatprep.subr.bf16.mxu1 %v2835_v47 }
 0x26b   : > { %2645 = vmatpush3.bf16.msra.mxu0 %v2834_v46  ;;  %2648 = vmatprep.mubr.bf16.mxu0 %v3303_v13 }
 0x26c   : > { %2646 = vmatprep.subr.bf16.mxu0 %v2836_v49 }
 0x26d   : > { %2621 = vmatpush3.bf16.msra.mxu1 %v2835_v47 }
 0x26e   : > { %2622 = vmatprep.subr.bf16.mxu1 %v2837_v20 }
 0x26f   : > { %2647 = vmatpush3.bf16.msra.mxu0 %v2836_v49 }
 0x271   : > { %2623 = vmatpush3.bf16.msra.mxu1 %v2837_v20 }
 0x272   : > { %2649 = vmatmul.mubr.bf16.vlgmr.msra.gmra.mrb[40].mxu0 %v3291_v63  ;;  %2656 = vmatprep.subr.bf16.mxu1 %v3350_v28 }
 0x274   : > { %2625 = vmatmul.mubr.bf16.vlgmr.msra.gmra.mrb[16].mxu1 %v3303_v13 }
 0x275   : > { %2628 = vmatprep.mubr.bf16.mxu1 %v3291_v63  ;;  %2664 = vmatpush3.bf16.msra.mxu1 %v3350_v28 }
 0x276   : > { %2657 = vmatprep.subr.bf16.mxu1 %v3359_v59 }
 0x279   : > { %2665 = vmatpush3.bf16.msra.mxu1 %v3359_v59 }
 0x27a   : > { %2658 = vmatprep.subr.bf16.mxu1 %v2826_v34 }
 0x27c   : > { %2629 = vmatmul.mubr.bf16.gmra.mrb[20].mxu1 %v3305_v15 }
 0x27d   : > { %2666 = vmatpush3.bf16.msra.mxu1 %v2826_v34  ;;  %2652 = vmatprep.mubr.bf16.mxu1 %v3305_v15 }
 0x27e   : > { %2659 = vmatprep.subr.bf16.mxu1 %v2828_v35 }
 0x281   : > { %2667 = vmatpush3.bf16.msra.mxu1 %v2828_v35 }
 0x282   : > { %2660 = vmatprep.subr.bf16.mxu1 %v2830_v39 }
 0x285   : > { %2668 = vmatpush3.bf16.msra.mxu1 %v2830_v39 }
 0x286   : > { %2661 = vmatprep.subr.bf16.mxu1 %v2832_v30 }
 0x289   : > { %2669 = vmatpush3.bf16.msra.mxu1 %v2832_v30 }
 0x28a   : > { %2662 = vmatprep.subr.bf16.mxu1 %v2834_v46 }
 0x28d   : > { %2670 = vmatpush3.bf16.msra.mxu1 %v2834_v46 }
 0x28e   : > { %2663 = vmatprep.subr.bf16.mxu1 %v2836_v49 }
 0x291   : > { %2671 = vmatpush3.bf16.msra.mxu1 %v2836_v49 }
 0x294   : > { %2653 = vmatmul.mubr.bf16.vlgmr.msra.gmra.mrb[20].mxu1 %v2353_v45 }
 0x305   : > { %v2466_v21 = vpop.f32.mrb[8].mxu0 }
 0x306   : > { %v2467_v50 = vpop.f32.mrb[9].mxu0 }
 0x307   : > { %v2468_v51 = vadd.f32 %v2467_v50, %v2466_v21  ;;  %v2414_v52 = vpop.f32.mrb[0].mxu1  ;;  %v2469_v53 = vpop.f32.mrb[10].mxu0 }
 0x308   : > { %v2415_v54 = vpop.f32.mrb[1].mxu1  ;;  %v2470_v32 = vpop.f32.mrb[11].mxu0 }
 0x309   : > { %v2416_v33 = vadd.f32 %v2415_v54, %v2414_v52  ;;  %v2471_v55 = vadd.f32 %v2470_v32, %v2469_v53  ;;  %v2417_v56 = vpop.f32.mrb[2].mxu1 }
 0x30a   : > { %v2418_v57 = vpop.f32.mrb[3].mxu1 }
 0x30b   : > { %v2419_v58 = vadd.f32 %v2418_v57, %v2417_v56  ;;  %v3429_v42 = vadd.f32 %v2468_v51, %v2416_v33 }
 0x30d   : > { %v2472_v44 = vpop.f32.mrb[12].mxu0  ;;  %v3431_v60 = vadd.f32 %v2471_v55, %v2419_v58 }
 0x30e   : > { %v2473_v14 = vpop.f32.mrb[13].mxu0 }
 0x30f   : > { %v2474_v3 = vadd.f32 %v2473_v14, %v2472_v44  ;;  %v2420_v0 = vpop.f32.mrb[4].mxu1  ;;  %v2475_v40 = vpop.f32.mrb[14].mxu0 }
 0x310   : > { %v2421_v1 = vpop.f32.mrb[5].mxu1  ;;  %v2476_v26 = vpop.f32.mrb[15].mxu0 }
 0x311   : > { %v2422_v36 = vadd.f32 %v2421_v1, %v2420_v0  ;;  %v2477_v2 = vadd.f32 %v2476_v26, %v2475_v40  ;;  %v2423_v5 = vpop.f32.mrb[6].mxu1 }
 0x312   : > { %v2424_v6 = vpop.f32.mrb[7].mxu1 }
 0x313   : > { %v2425_v62 = vadd.f32 %v2424_v6, %v2423_v5  ;;  %v2672_v63 = vadd.f32 %v2474_v3, %v2422_v36 }
 0x315   : > { %v2478_v7 = vpop.f32.mrb[16].mxu0  ;;  %v3433_v8 = vadd.f32 %v2477_v2, %v2425_v62 }
 0x316   : > { %v2479_v10 = vpop.f32.mrb[17].mxu0 }
 0x317   : > { %v2480_v11 = vadd.f32 %v2479_v10, %v2478_v7  ;;  %v2426_v12 = vpop.f32.mrb[8].mxu1  ;;  %v2481_v13 = vpop.f32.mrb[18].mxu0 }
 0x318   : > { %v2427_v15 = vpop.f32.mrb[9].mxu1  ;;  %v2482_v16 = vpop.f32.mrb[19].mxu0 }
 0x319   : > { %v2428_v18 = vadd.f32 %v2427_v15, %v2426_v12  ;;  %v2483_v19 = vadd.f32 %v2482_v16, %v2481_v13  ;;  %v2429_v22 = vpop.f32.mrb[10].mxu1 }
 0x31a   : > { %v2430_v23 = vpop.f32.mrb[11].mxu1 }
 0x31b   : > { %v2691_v24 = vadd.f32 %v2480_v11, %v2428_v18  ;;  %v2431_v27 = vadd.f32 %v2430_v23, %v2429_v22 }
 0x31d   : > { %v2697_v61 = vadd.f32 %v2483_v19, %v2431_v27  ;;  %v2484_v25 = vpop.f32.mrb[20].mxu0  ;;  %v2378_v19 = vld [vmem:[%s3462_s4] ss:$0 sm:$0xff] }
 0x31e   : > { %v2485_v4 = vpop.f32.mrb[21].mxu0 }
 0x31f   : > { %v2486_v28 = vadd.f32 %v2485_v4, %v2484_v25  ;;  %v2432_v31 = vpop.f32.mrb[12].mxu1  ;;  %v2487_v59 = vpop.f32.mrb[22].mxu0 }
 0x320   : > { %v2433_v9 = vpop.f32.mrb[13].mxu1  ;;  %v2488_v34 = vpop.f32.mrb[23].mxu0 }
 0x321   : > { %v2434_v17 = vadd.f32 %v2433_v9, %v2432_v31  ;;  %v2489_v35 = vadd.f32 %v2488_v34, %v2487_v59  ;;  %v2435_v37 = vpop.f32.mrb[14].mxu1 }
 0x322   : > { %v2436_v38 = vpop.f32.mrb[15].mxu1 }
 0x323   : > { %v2688_v39 = vadd.f32 %v2486_v28, %v2434_v17  ;;  %v2437_v29 = vadd.f32 %v2436_v38, %v2435_v37 }
 0x325   : > { %v2694_v30 = vadd.f32 %v2489_v35, %v2437_v29  ;;  %v2518_v41 = vpop.f32.mrb[24].mxu0 }
 0x326   : > { %v2519_v43 = vpop.f32.mrb[25].mxu0 }
 0x327   : > { %v2520_v46 = vadd.f32 %v2519_v43, %v2518_v41  ;;  %v2521_v47 = vpop.f32.mrb[26].mxu0 }
 0x328   : > { %v2522_v48 = vpop.f32.mrb[27].mxu0 }
 0x329   : > { %v2523_v49 = vadd.f32 %v2522_v48, %v2521_v47 }
 0x32d   : > { %v2524_v20 = vpop.f32.mrb[28].mxu0 }
 0x32e   : > { %v2525_v45 = vpop.f32.mrb[29].mxu0 }
 0x32f   : > { %v2526_v21 = vadd.f32 %v2525_v45, %v2524_v20  ;;  %v2527_v50 = vpop.f32.mrb[30].mxu0 }
 0x330   : > { %v2528_v51 = vpop.f32.mrb[31].mxu0 }
 0x331   : > { %v2529_v52 = vadd.f32 %v2528_v51, %v2527_v50 }
 0x335   : > { %v2530_v53 = vpop.f32.mrb[32].mxu0 }
 0x336   : > { %v2531_v54 = vpop.f32.mrb[33].mxu0 }
 0x337   : > { %v2532_v32 = vadd.f32 %v2531_v54, %v2530_v53  ;;  %v2533_v33 = vpop.f32.mrb[34].mxu0 }
 0x338   : > { %v2534_v55 = vpop.f32.mrb[35].mxu0 }
 0x339   : > { %v2535_v56 = vadd.f32 %v2534_v55, %v2533_v33  ;;  %v2692_v57 = vadd.f32 %v2691_v24, %v2532_v32 }
 0x33b   : > { %v2698_v58 = vadd.f32 %v2697_v61, %v2535_v56 }
 0x33d   : > { %v2536_v44 = vpop.f32.mrb[36].mxu0 }
 0x33e   : > { %v2537_v14 = vpop.f32.mrb[37].mxu0 }
 0x33f   : > { %v2538_v3 = vadd.f32 %v2537_v14, %v2536_v44  ;;  %v2539_v0 = vpop.f32.mrb[38].mxu0 }
 0x340   : > { %v2540_v40 = vpop.f32.mrb[39].mxu0 }
 0x341   : > { %v2541_v1 = vadd.f32 %v2540_v40, %v2539_v0  ;;  %v2689_v26 = vadd.f32 %v2688_v39, %v2538_v3 }
 0x343   : > { %v2695_v36 = vadd.f32 %v2694_v30, %v2541_v1 }
 0x345   : > { %v2650_v2 = vpop.f32.mrb[40].mxu0 }
 0x346   : > { %v2012_v5 = vpop.f32.mrb[41].mxu0 }
 0x347   : > { %v2626_v6 = vpop.f32.mrb[16].mxu1  ;;  %v2651_v62 = vpop.f32.mrb[42].mxu0 }
 0x348   : > { %v2673_v7 = vadd.f32 %v2672_v63, %v2626_v6  ;;  %v1683_v10 = vpop.f32.mrb[17].mxu1  ;;  %v2015_v11 = vpop.f32.mrb[43].mxu0 }
 0x349   : > { %v2677_v12 = vadd.f32 %v3429_v42, %v1683_v10  ;;  %v2627_v13 = vpop.f32.mrb[18].mxu1 }
 0x34a   : > { %v2674_v15 = vadd.f32 %v2673_v7, %v2526_v21  ;;  %v2681_v16 = vadd.f32 %v3433_v8, %v2627_v13  ;;  %v1686_v18 = vpop.f32.mrb[19].mxu1 }
 0x34b   : > { %v2678_v22 = vadd.f32 %v2677_v12, %v2520_v46  ;;  %v2685_v23 = vadd.f32 %v3431_v60, %v1686_v18 }
 0x34c   : > { %v2675_v24 = vadd.f32 %v2674_v15, %v2650_v2  ;;  %v2682_v27 = vadd.f32 %v2681_v16, %v2529_v52 }
 0x34d   : > { %v2679_v63 = vadd.f32 %v2678_v22, %v2012_v5  ;;  %v2686_v61 = vadd.f32 %v2685_v23, %v2523_v49 }
 0x34e   : > { %v2060_v25 = vadd.f32 %v2675_v24, %v2378_v19  ;;  %v2683_v4 = vadd.f32 %v2682_v27, %v2651_v62 }
 0x34f   : > { %v2058_v42 = vadd.f32 %v2679_v63, %v2378_v19  ;;  %v2687_v8 = vadd.f32 %v2686_v61, %v2015_v11 }
 0x350   : > { %v2068_v28 = vmax.f32 %v2060_v25, 0.0  ;;  %v2061_v60 = vadd.f32 %v2683_v4, %v2378_v19 }
 0x351   : > { %v2066_v31 = vmax.f32 %v2058_v42, 0.0  ;;  %v2059_v59 = vadd.f32 %v2687_v8, %v2378_v19 }
 0x352   : > { %2076 = vst [vmem:[%s3445_s23 + $0x10] sm:$0xff] %v2068_v28  ;;  %v2069_v9 = vmax.f32 %v2061_v60, 0.0 }
 0x353   : > { %2074 = vst [vmem:[%s3445_s23] sm:$0xff] %v2066_v31  ;;  %v2067_v34 = vmax.f32 %v2059_v59, 0.0 }
 0x354   : > { %2077 = vst [vmem:[%s3445_s23 + $0x18] sm:$0xff] %v2069_v9 }
 0x355   : > { %2075 = vst [vmem:[%s3445_s23 + $0x8] sm:$0xff] %v2067_v34 }
 0x367   : > { %v2654_v17 = vpop.f32.mrb[20].mxu1 }
 0x368   : > { %v2690_v35 = vadd.f32 %v2689_v26, %v2654_v17  ;;  %v2028_v37 = vpop.f32.mrb[21].mxu1 }
 0x369   : > { %v2693_v38 = vadd.f32 %v2692_v57, %v2028_v37  ;;  %v2655_v39 = vpop.f32.mrb[22].mxu1 }
 0x36a   : > { %v2064_v29 = vadd.f32 %v2690_v35, %v2378_v19  ;;  %v2696_v30 = vadd.f32 %v2695_v36, %v2655_v39  ;;  %v2031_v41 = vpop.f32.mrb[23].mxu1 }
 0x36b   : > { %v2062_v43 = vadd.f32 %v2693_v38, %v2378_v19  ;;  %v2699_v46 = vadd.f32 %v2698_v58, %v2031_v41 }
 0x36c   : > { %v2072_v47 = vmax.f32 %v2064_v29, 0.0  ;;  %v2065_v48 = vadd.f32 %v2696_v30, %v2378_v19 }
 0x36d   : > { %v2070_v49 = vmax.f32 %v2062_v43, 0.0  ;;  %v2063_v20 = vadd.f32 %v2699_v46, %v2378_v19 }
 0x36e   : > { %2080 = vst [vmem:[%s3445_s23 + $0x30] sm:$0xff] %v2072_v47  ;;  %v2073_v45 = vmax.f32 %v2065_v48, 0.0 }
 0x36f   : > { %2078 = vst [vmem:[%s3445_s23 + $0x20] sm:$0xff] %v2070_v49  ;;  %v2071_v21 = vmax.f32 %v2063_v20, 0.0 }
 0x370   : > { %2081 = vst [vmem:[%s3445_s23 + $0x38] sm:$0xff] %v2073_v45 }
 0x371   : > { %2079 = vst [vmem:[%s3445_s23 + $0x28] sm:$0xff] %v2071_v21 }
 0x372 PF: > { %s15_s18 = sadd.s32 1, %s2844_s18  }
 0x373   : > { %p12_p4 = scmp.ge.s32.totalorder %s15_s18, 4  }
 0x375   :  { %14 = sbr.rel (!%p12_p4) target bundleno = 1 (0x1), region = 75 }

</bundles_post_ra>
